<compile_context>
chip_gen: v7x
topology: tpu7x:2x2x1
jax: 0.10.0
libtpu: 0.0.40
codegen_flags: <defaults>
</compile_context>

<pallas_src>
import math

import jax
import jax.numpy as jnp
import numpy as np
from jax.experimental import pallas as pl
from jax.experimental.pallas import tpu as pltpu

LN_EPS = 1e-5  # torch.nn.LayerNorm default eps


def attention_kernel(emb_ref, w_ref, b_ref, gamma_ref, beta_ref,
                     sum_ref, att_ref):
    x = emb_ref[...].astype(jnp.float32)          # (TB, L, H)
    w = w_ref[...].astype(jnp.float32)            # (1, H)  (torch Linear weight (out=1, in=H))
    bias = b_ref[0]                               # scalar bias from SMEM

    _, L, _ = x.shape

    # --- Linear(H -> 1): score[b, l] = sum_h x[b,l,h] * w[0,h] + bias ---
    # Lane (H) reduction -> (TB, L), L lane-dense.
    score = jnp.sum(x * w[None, :, :], axis=-1) + bias        # (TB, L)

    # --- ReLU ---
    score = jnp.maximum(score, 0.0)

    # --- softmax over the sequence axis (torch dim=1 == last axis here) ---
    m = jnp.max(score, axis=-1, keepdims=True)                # (TB, 1)
    p = jnp.exp(score - m)
    denom = jnp.sum(p, axis=-1, keepdims=True)
    att = p * (1.0 / denom)                                   # (TB, L), exact (tolerance 1e-5)

    # --- weighted sum over sequence, scaled by 1/sqrt(L) ---
    pooled = jnp.sum(x * att[:, :, None], axis=1) * (1.0 / math.sqrt(L))   # (TB, H)

    # --- LayerNorm over hidden dim ---
    mean = jnp.mean(pooled, axis=-1, keepdims=True)
    centered = pooled - mean
    var = jnp.mean(centered * centered, axis=-1, keepdims=True)
    normed = centered * jax.lax.rsqrt(var + LN_EPS)
    out = normed * gamma_ref[...] + beta_ref[...]             # (TB, H), (1, H) broadcast

    sum_ref[...] = out.astype(sum_ref.dtype)                  # (TB, H) lane-dense
    att_ref[...] = att.astype(att_ref.dtype)                  # (TB, L) lane-dense store


def _pick_block_b(B, L, H, itemsize, budget_bytes=4 << 20):
    """Batch tile: whole batch if it fits the per-block budget, else a
    multiple of 8 (sublane alignment for the 2-D output blocks)."""
    per_row = max(L * H * itemsize, 1)
    fit = max(1, budget_bytes // per_row)
    if fit >= B:
        return B
    return max(8, (fit // 8) * 8)


def attention_forward(embding, w, b, gamma, beta, *, block_b=None):
    """embding: (B, L, H) f32; w: (1, H); b: (1,); gamma/beta: (1, H).

    Returns (sum_, att_rate) with att_rate shaped (B, L, 1) like the torch module.
    """
    B, L, H = embding.shape
    if block_b is None:
        block_b = _pick_block_b(B, L, H, jnp.dtype(embding.dtype).itemsize)
    block_b = min(block_b, B)
    grid = (pl.cdiv(B, block_b),)

    out_shapes = (
        jax.ShapeDtypeStruct((B, H), jnp.float32),   # layer-normed pooled vector
        jax.ShapeDtypeStruct((B, L), jnp.float32),   # attention rates (lane-dense)
    )

    bytes_acc = 4 * (B * L * H + B * (L + H) + 3 * H + 1)
    cost = pl.CostEstimate(
        flops=4 * B * L * H,        # score mul+add + pooled mul+add (softmax/LN negligible)
        transcendentals=B * L,      # exp
        bytes_accessed=bytes_acc,
    )

    sum_out, att2d = pl.pallas_call(
        attention_kernel,
        out_shape=out_shapes,
        grid=grid,
        in_specs=[
            pl.BlockSpec((block_b, L, H), lambda i: (i, 0, 0)),    # x: tiled over batch
            pl.BlockSpec((1, H), lambda i: (0, 0)),                # linear weight (constant)
            pl.BlockSpec(memory_space=pltpu.SMEM),                 # linear bias scalar -> SMEM
            pl.BlockSpec((1, H), lambda i: (0, 0)),                # layernorm gamma (constant)
            pl.BlockSpec((1, H), lambda i: (0, 0)),                # layernorm beta (constant)
        ],
        out_specs=(
            pl.BlockSpec((block_b, H), lambda i: (i, 0)),
            pl.BlockSpec((block_b, L), lambda i: (i, 0)),
        ),
        compiler_params=pltpu.CompilerParams(
            dimension_semantics=("parallel",),
        ),
        cost_estimate=cost,
    )(embding, w, b, gamma, beta)

    return sum_out, att2d[:, :, None]   # match torch att_rate shape (B, L, 1)


def _reference(embding, w, b, gamma, beta):
    """Pure-JAX reference of the exact PyTorch forward semantics."""
    L = embding.shape[1]
    score = jnp.einsum("blh,oh->blo", embding, w) + b              # (B, L, 1)
    score = jnp.maximum(score, 0.0)
    att = jax.nn.softmax(score, axis=1)                            # softmax over dim=1
    s = (embding * att).sum(axis=1) / math.sqrt(L)                 # (B, H)
    mean = s.mean(axis=-1, keepdims=True)
    var = ((s - mean) ** 2).mean(axis=-1, keepdims=True)
    out = (s - mean) / jnp.sqrt(var + LN_EPS) * gamma + beta
    return out, att


def _make_inputs(key, B, L, H):
    k_x, k_w, k_b = jax.random.split(key, 3)
    embding = jax.random.normal(k_x, (B, L, H), dtype=jnp.float32)
    w = jax.random.normal(k_w, (1, H), dtype=jnp.float32) * 0.1   # Linear weight (1, H)
    b = jax.random.normal(k_b, (1,), dtype=jnp.float32) * 0.1     # Linear bias (1,)
    gamma = jnp.ones((1, H), dtype=jnp.float32)                   # LayerNorm weight
    beta = jnp.zeros((1, H), dtype=jnp.float32)                   # LayerNorm bias
    return embding, w, b, gamma, beta


if __name__ == "__main__":
    key = jax.random.PRNGKey(0)

    # Small case matching the module's typical tiny shapes (single grid step).
    B, L, H = 2, 8, 32
    emb, w, b, gamma, beta = _make_inputs(key, B, L, H)
    sum_out, att_out = attention_forward(emb, w, b, gamma, beta)
    jax.block_until_ready((sum_out, att_out))
    sum_ref, att_ref = _reference(emb, w, b, gamma, beta)
    assert np.allclose(np.asarray(sum_out), np.asarray(sum_ref), atol=1e-4, rtol=1e-4)
    assert np.allclose(np.asarray(att_out), np.asarray(att_ref), atol=1e-5, rtol=1e-5)

    # Larger case with a forced batch tile to exercise the multi-step pipeline.
    B2, L2, H2 = 16, 128, 256
    emb2, w2, b2, gamma2, beta2 = _make_inputs(jax.random.PRNGKey(1), B2, L2, H2)
    sum2, att2 = attention_forward(emb2, w2, b2, gamma2, beta2, block_b=8)
    jax.block_until_ready((sum2, att2))
    sum2_ref, att2_ref = _reference(emb2, w2, b2, gamma2, beta2)
    assert np.allclose(np.asarray(sum2), np.asarray(sum2_ref), atol=1e-4, rtol=1e-4)
    assert np.allclose(np.asarray(att2), np.asarray(att2_ref), atol=1e-5, rtol=1e-5)

    print("KERNEL_OK")
</pallas_src>

<mosaic_0001>
module attributes {stable_mosaic.version = 11 : i64} {
  func.func @attention_kernel(%arg0: i32, %arg1: memref<2x8x32xf32, #tpu.memory_space<vmem>>, %arg2: memref<1x32xf32, #tpu.memory_space<vmem>>, %arg3: memref<1xf32, #tpu.memory_space<smem>>, %arg4: memref<1x32xf32, #tpu.memory_space<vmem>>, %arg5: memref<1x32xf32, #tpu.memory_space<vmem>>, %arg6: memref<2x32xf32, #tpu.memory_space<vmem>>, %arg7: memref<2x8xf32, #tpu.memory_space<vmem>>) attributes {dimension_semantics = [#tpu.dimension_semantics<parallel>], iteration_bounds = array<i64: 1>, scalar_prefetch = 0 : i64, scratch_operands = 0 : i64, tpu.core_type = #tpu.core_type<tc>, window_params = [{transform_indices = @transform_0, window_bounds = array<i64: 2, 8, 32>}, {pipeline_mode = #tpu.pipeline_mode<synchronous>, transform_indices = @transform_1, window_bounds = array<i64: 1, 32>}, {transform_indices = @transform_2, window_bounds = array<i64: 1>}, {pipeline_mode = #tpu.pipeline_mode<synchronous>, transform_indices = @transform_3, window_bounds = array<i64: 1, 32>}, {pipeline_mode = #tpu.pipeline_mode<synchronous>, transform_indices = @transform_4, window_bounds = array<i64: 1, 32>}, {transform_indices = @transform_5, window_bounds = array<i64: 2, 32>}, {transform_indices = @transform_6, window_bounds = array<i64: 2, 8>}]} {
    %c0 = arith.constant 0 : index
    %c0_0 = arith.constant 0 : index
    %c0_1 = arith.constant 0 : index
    %0 = vector.load %arg1[%c0, %c0_0, %c0_1] : memref<2x8x32xf32, #tpu.memory_space<vmem>>, vector<2x8x32xf32>
    %c0_2 = arith.constant 0 : index
    %c0_3 = arith.constant 0 : index
    %1 = vector.load %arg2[%c0_2, %c0_3] : memref<1x32xf32, #tpu.memory_space<vmem>>, vector<1x32xf32>
    %c0_4 = arith.constant 0 : index
    %2 = memref.load %arg3[%c0_4] : memref<1xf32, #tpu.memory_space<smem>>
    %3 = vector.shape_cast %1 : vector<1x32xf32> to vector<1x1x32xf32>
    %4 = vector.broadcast %3 : vector<1x1x32xf32> to vector<2x8x32xf32>
    %5 = arith.mulf %0, %4 : vector<2x8x32xf32>
    %cst = arith.constant dense<0.000000e+00> : vector<2x8xf32>
    %6 = vector.multi_reduction <add>, %5, %cst [2] : vector<2x8x32xf32> to vector<2x8xf32>
    %7 = vector.broadcast %2 : f32 to vector<2x8xf32>
    %8 = arith.addf %6, %7 : vector<2x8xf32>
    %cst_5 = arith.constant 0.000000e+00 : f32
    %9 = vector.broadcast %cst_5 : f32 to vector<2x8xf32>
    %10 = arith.maximumf %8, %9 : vector<2x8xf32>
    %cst_6 = arith.constant dense<0xFF800000> : vector<2xf32>
    %11 = vector.multi_reduction <maximumf>, %10, %cst_6 [1] : vector<2x8xf32> to vector<2xf32>
    %12 = vector.shape_cast %11 : vector<2xf32> to vector<2x1xf32>
    %13 = vector.broadcast %12 : vector<2x1xf32> to vector<2x8xf32>
    %14 = arith.subf %10, %13 : vector<2x8xf32>
    %15 = math.exp %14 : vector<2x8xf32>
    %cst_7 = arith.constant dense<0.000000e+00> : vector<2xf32>
    %16 = vector.multi_reduction <add>, %15, %cst_7 [1] : vector<2x8xf32> to vector<2xf32>
    %17 = vector.shape_cast %16 : vector<2xf32> to vector<2x1xf32>
    %cst_8 = arith.constant 1.000000e+00 : f32
    %18 = vector.broadcast %cst_8 : f32 to vector<2x1xf32>
    %19 = arith.divf %18, %17 : vector<2x1xf32>
    %20 = vector.broadcast %19 : vector<2x1xf32> to vector<2x8xf32>
    %21 = arith.mulf %15, %20 : vector<2x8xf32>
    %22 = vector.shape_cast %21 : vector<2x8xf32> to vector<2x8x1xf32>
    %23 = vector.broadcast %22 : vector<2x8x1xf32> to vector<2x8x32xf32>
    %24 = arith.mulf %0, %23 : vector<2x8x32xf32>
    %cst_9 = arith.constant dense<0.000000e+00> : vector<2x32xf32>
    %25 = vector.multi_reduction <add>, %24, %cst_9 [1] : vector<2x8x32xf32> to vector<2x32xf32>
    %cst_10 = arith.constant 0.353553385 : f32
    %26 = vector.broadcast %cst_10 : f32 to vector<2x32xf32>
    %27 = arith.mulf %25, %26 : vector<2x32xf32>
    %cst_11 = arith.constant dense<0.000000e+00> : vector<2xf32>
    %28 = vector.multi_reduction <add>, %27, %cst_11 [1] : vector<2x32xf32> to vector<2xf32>
    %29 = vector.shape_cast %28 : vector<2xf32> to vector<2x1xf32>
    %cst_12 = arith.constant 3.200000e+01 : f32
    %30 = vector.broadcast %cst_12 : f32 to vector<2x1xf32>
    %31 = arith.divf %29, %30 : vector<2x1xf32>
    %32 = vector.broadcast %31 : vector<2x1xf32> to vector<2x32xf32>
    %33 = arith.subf %27, %32 : vector<2x32xf32>
    %34 = arith.mulf %33, %33 : vector<2x32xf32>
    %cst_13 = arith.constant dense<0.000000e+00> : vector<2xf32>
    %35 = vector.multi_reduction <add>, %34, %cst_13 [1] : vector<2x32xf32> to vector<2xf32>
    %36 = vector.shape_cast %35 : vector<2xf32> to vector<2x1xf32>
    %cst_14 = arith.constant 3.200000e+01 : f32
    %37 = vector.broadcast %cst_14 : f32 to vector<2x1xf32>
    %38 = arith.divf %36, %37 : vector<2x1xf32>
    %cst_15 = arith.constant 9.99999974E-6 : f32
    %39 = vector.broadcast %cst_15 : f32 to vector<2x1xf32>
    %40 = arith.addf %38, %39 : vector<2x1xf32>
    %41 = math.rsqrt %40 : vector<2x1xf32>
    %42 = vector.broadcast %41 : vector<2x1xf32> to vector<2x32xf32>
    %43 = arith.mulf %33, %42 : vector<2x32xf32>
    %c0_16 = arith.constant 0 : index
    %c0_17 = arith.constant 0 : index
    %44 = vector.load %arg4[%c0_16, %c0_17] : memref<1x32xf32, #tpu.memory_space<vmem>>, vector<1x32xf32>
    %45 = vector.broadcast %44 : vector<1x32xf32> to vector<2x32xf32>
    %46 = arith.mulf %43, %45 : vector<2x32xf32>
    %c0_18 = arith.constant 0 : index
    %c0_19 = arith.constant 0 : index
    %47 = vector.load %arg5[%c0_18, %c0_19] : memref<1x32xf32, #tpu.memory_space<vmem>>, vector<1x32xf32>
    %48 = vector.broadcast %47 : vector<1x32xf32> to vector<2x32xf32>
    %49 = arith.addf %46, %48 : vector<2x32xf32>
    %c0_20 = arith.constant 0 : index
    %c0_21 = arith.constant 0 : index
    %50 = vector.load %arg6[%c0_20, %c0_21] : memref<2x32xf32, #tpu.memory_space<vmem>>, vector<2x32xf32>
    tpu.vector_store %arg6[%c0_20, %c0_21], %49 {strides = array<i32>} : memref<2x32xf32, #tpu.memory_space<vmem>>, vector<2x32xf32>,
    %c0_22 = arith.constant 0 : index
    %c0_23 = arith.constant 0 : index
    %51 = vector.load %arg7[%c0_22, %c0_23] : memref<2x8xf32, #tpu.memory_space<vmem>>, vector<2x8xf32>
    tpu.vector_store %arg7[%c0_22, %c0_23], %21 {strides = array<i32>} : memref<2x8xf32, #tpu.memory_space<vmem>>, vector<2x8xf32>,
    return
  }
  func.func @transform_0(%arg0: i32) -> (i32, i32, i32) {
    %c0_i32 = arith.constant 0 : i32
    %c0_i32_0 = arith.constant 0 : i32
    %c0_i32_1 = arith.constant 0 : i32
    return %arg0, %c0_i32, %c0_i32_0 : i32, i32, i32
  }
  func.func @transform_1(%arg0: i32) -> (i32, i32) {
    %c0_i32 = arith.constant 0 : i32
    %c0_i32_0 = arith.constant 0 : i32
    %c0_i32_1 = arith.constant 0 : i32
    return %c0_i32, %c0_i32_0 : i32, i32
  }
  func.func @transform_2(%arg0: i32) -> i32 {
    %c0_i32 = arith.constant 0 : i32
    %c0_i32_0 = arith.constant 0 : i32
    return %c0_i32 : i32
  }
  func.func @transform_3(%arg0: i32) -> (i32, i32) {
    %c0_i32 = arith.constant 0 : i32
    %c0_i32_0 = arith.constant 0 : i32
    %c0_i32_1 = arith.constant 0 : i32
    return %c0_i32, %c0_i32_0 : i32, i32
  }
  func.func @transform_4(%arg0: i32) -> (i32, i32) {
    %c0_i32 = arith.constant 0 : i32
    %c0_i32_0 = arith.constant 0 : i32
    %c0_i32_1 = arith.constant 0 : i32
    return %c0_i32, %c0_i32_0 : i32, i32
  }
  func.func @transform_5(%arg0: i32) -> (i32, i32) {
    %c0_i32 = arith.constant 0 : i32
    %c0_i32_0 = arith.constant 0 : i32
    return %arg0, %c0_i32 : i32, i32
  }
  func.func @transform_6(%arg0: i32) -> (i32, i32) {
    %c0_i32 = arith.constant 0 : i32
    %c0_i32_0 = arith.constant 0 : i32
    return %arg0, %c0_i32 : i32, i32
  }
}

</mosaic_0001>

<bundles_post_ra>
// kernel: tpu_custom_call.1
= control target key start
LH: loop header
LB: loop body
LE: loop exit
PB: predicated region body
PF: predicated region fallthrough
CT: control target
= control target key end

     0   :  { %13 = vsyncpa [#allocation4], 0  ;;  %s466_s0 = inlined_call_operand.hbm [shape: f32[2,8,32], index: 0, kind: input, shape index: {}]   ;;  %s467_s1 = inlined_call_operand.vmem [shape: f32[1,32], index: 1, kind: input, shape index: {}]   ;;  %s468_s2 = inlined_call_operand.<no memory space> [shape: f32[1], index: 2, kind: input, shape index: {}]   ;;  %s469_s3 = inlined_call_operand.vmem [shape: f32[1,32], index: 3, kind: input, shape index: {}]   ;;  %s470_s4 = inlined_call_operand.vmem [shape: f32[1,32], index: 4, kind: input, shape index: {}]   ;;  %s471_s5 = inlined_call_operand.hbm [shape: f32[2,32], index: 5, kind: output, shape index: {0}]   ;;  %s472_s6 = inlined_call_operand.hbm [shape: f32[2,8], index: 6, kind: output, shape index: {1}]  }
   0x1   :  { %14 = vsyncpa [#allocation5], 0 }
   0x2   :  { %15 = vsyncpa [#allocation8], 0  ;;  %s353_s21 = smov [#allocation3]   ;;  %s281_s25 = scalar_lea.hbm %s466_s0, 256 }
   0x3   :  { %s21_s22 = sshll.u32 %s353_s21, 4  ;;  %p282_p0 = scmp.ne.s32.totalorder %s466_s0, %s281_s25  ;;  %s22_s22 = int_to_ptr.vmem [resolvable:$true] %s21_s22 }
   0x4   :  { %p285_p1 = scmp.lt.u32.totalorder %s281_s25, %s466_s0 }
   0x6   :  { %p287_p2 = pnand %p285_p1, %p282_p0 }
   0x8   :  { %290 = shalt.err (!%p287_p2)
}
   0x9   :  { %s291_s30 = scalar_lea.vmem %s22_s22, 256  ;;  %p296_p4 = scmp.lt.s32.totalorder %s22_s22, %s22_s22 }
   0xa   :  { %p292_p3 = scmp.ne.s32.totalorder %s22_s22, %s291_s30  ;;  %p297_p5 = scmp.lt.s32.totalorder %s291_s30, %s291_s30 }
   0xc   :  { %p298_p6 = por %p297_p5, %p296_p4 }
   0xe   :  { %p299_p7 = pnand %p298_p6, %p292_p3 }
  0x10   :  { %302 = shalt.err (!%p299_p7)
}
  0x11   :  { %s354_s7 = smov 128   ;;  %s355_s8 = smov 8  }
  0x12   :  { %27 = dma.hbm_to_vmem [thread:$0]  %s466_s0, 256, %s22_s22, [#allocation4], %s354_s7, %s354_s7, %s355_s8  }
  0x13   :  { %347 = dma.done.wait [#allocation4], 256  }
  0x14   :  { %348 = vsyncadd [#allocation4], 4294967040  ;;  %v406_v0 = vld [vmem:[#allocation3] sm:$0xff]  ;;  %vm51_vm0 = vcmask 261120   ;;  %v411_v2 = vld [vmem:[#allocation3 + $0x8] sm:$0xff]  ;;  %v65_v7 = vlaneseq  ;;  %v58_v8 = vstv %s468_s2  ;;  %vm75_vm1 = vcmask 1041409  }
  0x15   :  { %v262_v1 = vld [vmem:[%s467_s1] ss:$0 sm:$0xff]  ;;  %vm78_vm2 = vcmask 58368   ;;  %v356_v22 = vmov 0   ;;  %vm167_vm3 = vcmask 254976   ;;  %s357_s1 = smov [#allocation7]  }
  0x16   :  { %v49_v3 = vmul.f32 %v262_v1, %v406_v0  ;;  %v50_v4 = vmul.f32 %v262_v1, %v411_v2  ;;  %v66_v10 = vand.u32 127, %v65_v7  ;;  %v68_v11 = vshrl.u32 %v65_v7, 7  ;;  %272 = vset.pattern.permute.xlu0 %v356_v22  ;;  %271 = vset.pattern.permute.xlu1 %v356_v22  ;;  %s249_s2 = sshll.u32 %s357_s1, 4  ;;  %s250_s2 = int_to_ptr.vmem [resolvable:$true] %s249_s2 }
  0x17   :  { %s303_s14 = scalar_lea.vmem %s250_s2, 32  ;;  %p308_p9 = scmp.lt.s32.totalorder %s250_s2, %s250_s2 }
  0x18   :  { %v52_v5 = vsel %vm51_vm0, %v49_v3, 0.0  ;;  %v55_v6 = vsel %vm51_vm0, %v50_v4, 0.0  ;;  %v69_v14 = vsub.s32 %v66_v10, %v68_v11  ;;  %v85_v23 = vsub.s32 0, %v68_v11  ;;  %p304_p8 = scmp.ne.s32.totalorder %s250_s2, %s303_s14  ;;  %p309_p10 = scmp.lt.s32.totalorder %s303_s14, %s303_s14 }
  0x19   :  { %53 = vadd.xlane.f32.xlu0 %v52_v5  ;;  %v89_v24 = vsub.s32 1, %v68_v11 }
  0x1a   :  { %p310_p11 = por %p309_p10, %p308_p9 }
  0x1c   :  { %p311_p12 = pnand %p310_p11, %p304_p8 }
  0x1d   :  { %56 = vadd.xlane.f32.xlu0 %v55_v6 }
  0xa6   :  { %v54_v9 = vpop.xlane.xlu0 %53 }
  0xa7   :  { %v59_v12 = vadd.f32 %v58_v8, %v54_v9 }
  0xa9   :  { %v61_v15 = vmax.f32 %v59_v12, 0.0 }
  0xaa   :  { %v57_v13 = vpop.xlane.xlu0 %56 }
  0xab   :  { %v60_v16 = vadd.f32 %v58_v8, %v57_v13  ;;  %v70_v18 = vrot.slane %v61_v15, %v69_v14 }
  0xad   :  { %v62_v17 = vmax.f32 %v60_v16, 0.0 }
  0xaf   :  { %v74_v19 = vrot.slane %v62_v17, %v69_v14 }
  0xb1   :  { %v76_v20 = vsel %vm75_vm1, %v74_v19, %v70_v18 }
  0xb2   :  { %v79_v21 = vsel %vm78_vm2, %v76_v20, -inf }
  0xb3   :  { %80 = vmax.xlane.f32.xlu1 %v79_v21 }
 0x140   :  { %v81_v25 = vpop.xlane.xlu1 %80 }
 0x141   :  { %v86_v26 = vrot.slane %v81_v25, %v85_v23  ;;  %v90_v27 = vrot.slane %v81_v25, %v89_v24 }
 0x143   :  { %v93_v28 = vsub.f32 %v61_v15, %v86_v26  ;;  %v94_v29 = vsub.f32 %v62_v17, %v90_v27 }
 0x145   :  { %v95_v30 = vmul.f32 1.442695, %v93_v28  ;;  %v97_v31 = vmul.f32 1.442695, %v94_v29 }
 0x147   :  { %273 = vpow2.f32 %v95_v30 }
 0x148   :  { %275 = vpow2.f32 %v97_v31 }
 0x151   :  { %v274_v32 = vpop.eup %273 }
 0x152   :  { %v276_v33 = vpop.eup %275  ;;  %102 = vperm.xlu1 %271, %v274_v32  }
 0x153   :  { %105 = vperm.xlu0 %272, %v276_v33  }
 0x1d1   :  { %v103_v34 = vpop.permute.xlu1 %102 }
 0x1d2   :  { %v106_v35 = vpop.permute.xlu0 %105  ;;  %v110_v36 = vrot.slane %v103_v34, %v69_v14 }
 0x1d3   :  { %v114_v37 = vrot.slane %v106_v35, %v69_v14 }
 0x1d5   :  { %v115_v38 = vsel %vm75_vm1, %v114_v37, %v110_v36 }
 0x1d6   :  { %v117_v39 = vsel %vm78_vm2, %v115_v38, 0.0 }
 0x1d7   :  { %118 = vadd.xlane.f32.xlu1 %v117_v39 }
 0x264   :  { %v119_v40 = vpop.xlane.xlu1 %118 }
 0x265   :  { %277 = vrcp.f32 %v119_v40 }
 0x26f   :  { %v278_v41 = vpop.eup %277 }
 0x270   :  { %v126_v42 = vrot.slane %v278_v41, %v85_v23  ;;  %v130_v44 = vrot.slane %v278_v41, %v89_v24 }
 0x272   :  { %v133_v43 = vmul.f32 %v274_v32, %v126_v42  ;;  %v134_v45 = vmul.f32 %v276_v33, %v130_v44 }
 0x274   :  { %137 = vperm.xlu0 %272, %v133_v43  }
 0x278   :  { %142 = vperm.xlu0 %272, %v134_v45  }
 0x2f3   :  { %v138_v46 = vpop.permute.xlu0 %137 }
 0x2f4   :  { %v145_v47 = vmul.f32 %v138_v46, %v406_v0  ;;  %v225_v51 = vrot.slane %v138_v46, %v69_v14 }
 0x2f6   :  { %v147_v48 = vsel %vm51_vm0, %v145_v47, 0.0 }
 0x2f7   :  { %v148_v49 = vrot.slane %v147_v48, 4  ;;  %v143_v50 = vpop.permute.xlu0 %142 }
 0x2f8   :  { %v146_v52 = vmul.f32 %v143_v50, %v411_v2  ;;  %v229_v53 = vrot.slane %v143_v50, %v69_v14 }
 0x2f9   :  { %v149_v54 = vadd.f32 %v148_v49, %v147_v48 }
 0x2fa   :  { %v154_v55 = vsel %vm51_vm0, %v146_v52, 0.0  ;;  %v230_v56 = vsel %vm75_vm1, %v229_v53, %v225_v51 }
 0x2fb   :  { %v150_v57 = vrot.slane %v149_v54, 2  ;;  %v155_v58 = vrot.slane %v154_v55, 4  ;;  %232 = vst.msk [vmem:[#allocation7] sm:$0x3] %vm78_vm2, %v230_v56 }
 0x2fd   :  { %v151_v59 = vadd.f32 %v150_v57, %v149_v54  ;;  %v156_v60 = vadd.f32 %v155_v58, %v154_v55 }
 0x2ff   :  { %v157_v61 = vrot.slane %v156_v60, 2  ;;  %v152_v62 = vrot.slane %v151_v59, 1 }
 0x301   :  { %v158_v63 = vadd.f32 %v157_v61, %v156_v60  ;;  %v153_v0 = vadd.f32 %v152_v62, %v151_v59 }
 0x303   :  { %v159_v1 = vrot.slane %v158_v63, 1  ;;  %v161_v4 = vmul.f32 0.35355338, %v153_v0 }
 0x305   :  { %v160_v3 = vadd.f32 %v159_v1, %v158_v63 }
 0x307   :  { %v162_v2 = vmul.f32 0.35355338, %v160_v3 }
 0x309   :  { %v165_v5 = vsel %vm75_vm1, %v162_v2, %v161_v4 }
 0x30a   :  { %v168_v6 = vsel %vm167_vm3, %v165_v5, 0.0 }
 0x30b   :  { %169 = vadd.xlane.f32.xlu1 %v168_v6 }
 0x398   :  { %v170_v7 = vpop.xlane.xlu1 %169 }
 0x399   :  { %v172_v8 = vmul.f32 0.03125, %v170_v7 }
 0x39b   :  { %v174_v9 = vrot.slane %v172_v8, 1  ;;  %v177_v10 = vsub.f32 %v161_v4, %v172_v8 }
 0x39d   :  { %v178_v11 = vsub.f32 %v162_v2, %v174_v9  ;;  %v179_v13 = vmul.f32 %v177_v10, %v177_v10 }
 0x39f   :  { %v180_v12 = vmul.f32 %v178_v11, %v178_v11 }
 0x3a1   :  { %v183_v14 = vrot.slane %v180_v12, 7 }
 0x3a3   :  { %v184_v15 = vsel %vm75_vm1, %v183_v14, %v179_v13 }
 0x3a4   :  { %v186_v16 = vsel %vm167_vm3, %v184_v15, 0.0 }
 0x3a5   :  { %187 = vadd.xlane.f32.xlu0 %v186_v16 }
 0x3a6   :  { %314 = shalt.err (!%p311_p12)
}
 0x3a7   :  { %s315_s17 = scalar_lea.hbm %s472_s6, 32 }
 0x3a8   :  { %p316_p13 = scmp.ne.s32.totalorder %s472_s6, %s315_s17  ;;  %p319_p0 = scmp.lt.u32.totalorder %s315_s17, %s472_s6 }
 0x3aa   :  { %p321_p1 = pnand %p319_p0, %p316_p13 }
 0x3ac   :  { %324 = shalt.err (!%p321_p1)
}
 0x3ad   :  { %252 = dma.vmem_to_hbm [thread:$0]  %s250_s2, 32, %s472_s6, [#allocation8]   ;;  %v263_v23 = vld [vmem:[%s469_s3] ss:$0 sm:$0xff] }
 0x3ae   :  { %v264_v27 = vld [vmem:[%s470_s4] ss:$0 sm:$0xff]  ;;  %s358_s6 = smov [#allocation6]  }
 0x3af   :  { %s239_s28 = sshll.u32 %s358_s6, 4  ;;  %s240_s28 = int_to_ptr.vmem [resolvable:$true] %s239_s28 }
 0x3b0   :  { %s325_s29 = scalar_lea.vmem %s240_s28, 32  ;;  %p330_p3 = scmp.lt.s32.totalorder %s240_s28, %s240_s28 }
 0x3b1   :  { %p326_p2 = scmp.ne.s32.totalorder %s240_s28, %s325_s29  ;;  %p331_p4 = scmp.lt.s32.totalorder %s325_s29, %s325_s29 }
 0x3b3   :  { %p332_p5 = por %p331_p4, %p330_p3 }
 0x3b5   :  { %p333_p6 = pnand %p332_p5, %p326_p2 }
 0x432   :  { %v188_v17 = vpop.xlane.xlu0 %187 }
 0x433   :  { %v189_v18 = vmul.f32 0.03125, %v188_v17 }
 0x435   :  { %v190_v19 = vadd.f32 1e-05, %v189_v18 }
 0x437   :  { %279 = vrsqrt.f32 %v190_v19 }
 0x441   :  { %v280_v20 = vpop.eup %279 }
 0x442   :  { %v193_v21 = vrot.slane %v280_v20, 1  ;;  %v196_v22 = vmul.f32 %v280_v20, %v177_v10 }
 0x444   :  { %v197_v24 = vmul.f32 %v193_v21, %v178_v11  ;;  %v205_v25 = vmul.f32 %v263_v23, %v196_v22 }
 0x446   :  { %v206_v26 = vmul.f32 %v263_v23, %v197_v24  ;;  %v214_v29 = vadd.f32 %v264_v27, %v205_v25 }
 0x448   :  { %v215_v28 = vadd.f32 %v264_v27, %v206_v26 }
 0x44a   :  { %v218_v30 = vrot.slane %v215_v28, 7 }
 0x44c   :  { %v219_v31 = vsel %vm75_vm1, %v218_v30, %v214_v29 }
 0x44d   :  { %221 = vst.msk [vmem:[#allocation6] sm:$0x3] %vm167_vm3, %v219_v31 }
 0x44e   :  { %336 = shalt.err (!%p333_p6)
}
 0x44f   :  { %s337_s4 = scalar_lea.hbm %s471_s5, 32 }
 0x450   :  { %p338_p7 = scmp.ne.s32.totalorder %s471_s5, %s337_s4  ;;  %p341_p8 = scmp.lt.u32.totalorder %s337_s4, %s471_s5 }
 0x452   :  { %p343_p9 = pnand %p341_p8, %p338_p7 }
 0x454   :  { %346 = shalt.err (!%p343_p9)
}
 0x455   :  { %242 = dma.vmem_to_hbm [thread:$0]  %s240_s28, 32, %s471_s5, [#allocation5]  }
 0x456   :  { %349 = dma.done.wait [#allocation5], 32  }
 0x457   :  { %350 = vsyncadd [#allocation5], 4294967264 }
 0x458   :  { %351 = dma.done.wait [#allocation8], 32  }
 0x459   :  { %352 = vsyncadd [#allocation8], 4294967264 }
 0x45a   :  { %259 = vsyncpa [#allocation4], 1 }
 0x45b   :  { %260 = vsyncpa [#allocation5], 1 }
 0x45c   :  { %261 = vsyncpa [#allocation8], 1 }

</bundles_post_ra>
